<compile_context>
chip_gen: v5e
topology: v5e:2x2
jax: 0.10.0
libtpu: 0.0.40
codegen_flags: <defaults>
</compile_context>

<pallas_src>
import functools

import jax
import jax.numpy as jnp
import numpy as np
from jax.experimental import pallas as pl
from jax.experimental.pallas import tpu as pltpu


def _round_up(x, m):
    return (x + m - 1) // m * m


def _cdiv(a, b):
    return -(-a // b)


def _vmem_capacity_bytes():
    try:
        return int(pltpu.get_tpu_info().vmem_capacity_bytes)
    except Exception:
        return 128 << 20  # v5e / v6e default


def _row(ref, r):
    """Load packed row `r` of a (bt, 8, W) container ref -> (bt, W)."""
    return ref[:, r:r + 1, :][:, 0, :]


def _make_kkt_kernel(w_primal, w_dual, w_station, w_comp):
    def kernel(a_ref, vm_ref, vn_ref, out_ref, ax_acc, ns_acc):
        # a_ref : (bt, M_pad, tn) bf16 A tile (padded rows/cols are zero)
        # vm_ref: (bt, 8, M_pad) f32  rows: 0=lam, 1=b, 2=(1/m_i)/B
        # vn_ref: (bt, 8, tn)    f32  rows: 0=x,   1=c, 2=(1/n_i)/B
        # out_ref: (1, 8, 128)   partial sum for this batch block
        # ax_acc : (bt, M_pad) f32  running A x   (accumulated over N tiles)
        # ns_acc : (bt, 1)     f32  running sum (c + A^T lam)^2 over N tiles
        k = pl.program_id(1)

        @pl.when(k == 0)
        def _init():
            ax_acc[...] = jnp.zeros_like(ax_acc)
            ns_acc[...] = jnp.zeros_like(ns_acc)

        a = a_ref[...]                                    # bf16, no f32 copy
        x_bf = vn_ref[:, 0:1, :].astype(jnp.bfloat16)     # (bt, 1, tn)
        lam_bf = vm_ref[:, 0:1, :].astype(jnp.bfloat16)   # (bt, 1, M_pad)

        # A x (partial over this N tile).  A is the streamed LHS, contracting
        # over its native lane dim; only the tiny (bt,1,tn) operand is
        # effectively transposed.  Native bf16 inputs, f32 accumulation.
        p = jnp.einsum('bmn,bkn->bmk', a, x_bf,
                       preferred_element_type=jnp.float32)  # (bt, M_pad, 1)
        # Reduce over the unit dim (== squeeze), expressed as a lane
        # reduction so Mosaic emits the canonical (bt, M_pad) layout.
        ax_acc[...] += jnp.sum(p, axis=-1)

        # A^T lam is complete for this N tile (contraction is over M).
        q = jnp.einsum('bkm,bmn->bkn', lam_bf, a,
                       preferred_element_type=jnp.float32)  # (bt, 1, tn)
        stat = _row(vn_ref, 1) + q[:, 0, :]                 # c + A^T lam
        ns_acc[...] += jnp.sum(stat * stat, axis=-1, keepdims=True)

        @pl.when(k == pl.num_programs(1) - 1)
        def _finalize():
            lam = _row(vm_ref, 0)                 # (bt, M_pad) f32
            b = _row(vm_ref, 1)
            inv_m = _row(vm_ref, 2)[:, 0:1]       # (bt, 1)  (1/m_i)/B
            inv_n = _row(vn_ref, 2)[:, 0:1]       # (bt, 1)  (1/n_i)/B
            r = ax_acc[...] - b                   # Ax - b (zero on padding)
            m_terms = (w_primal * jnp.maximum(r, 0.0) ** 2
                       + w_dual * jnp.maximum(-lam, 0.0) ** 2
                       + w_comp * (lam * r) ** 2)
            sm = jnp.sum(m_terms, axis=-1, keepdims=True)        # (bt, 1)
            per_inst = sm * inv_m + (w_station * ns_acc[...]) * inv_n
            total = jnp.sum(per_inst)
            out_ref[...] = jnp.broadcast_to(total, out_ref.shape)

    return kernel


@functools.partial(jax.jit,
                   static_argnames=("w_primal", "w_dual", "w_station",
                                    "w_comp"))
def kkt_loss_pallas(a_pad, x_pad, lam_pad, b_pad, c_pad, m_sizes, n_sizes,
                    *, w_primal=0.1, w_dual=0.1, w_station=0.6, w_comp=0.2):
    B, M, N = a_pad.shape
    f32 = jnp.float32

    # bf16 native sublane tile is (16, 128): pad M to 16, N to 128.
    M_pad = _round_up(max(M, 16), 16)
    N_pad = _round_up(max(N, 128), 128)

    # ---- per-generation block / VMEM budgets --------------------------------
    vmem_cap = _vmem_capacity_bytes()
    if vmem_cap >= (100 << 20):           # v5e / v6e : 128 MiB physical VMEM
        blk_budget = 14 << 20
        vmem_ceiling = int(vmem_cap * 0.80)
    else:                                  # v7x : 64 MiB physical VMEM
        blk_budget = 7 << 20
        vmem_ceiling = int(vmem_cap * 0.75)

    inst_bytes = M_pad * N_pad * 2        # one instance of bf16 A

    if inst_bytes > blk_budget:
        # A single instance exceeds the block budget: tile the N axis with an
        # inner "arbitrary" grid axis (keeps very large LPs inside v7x VMEM).
        bt = 1
        units = N_pad // 128
        max_units = max(1, blk_budget // (M_pad * 2 * 128))
        d = min(units, max_units)
        while units % d:
            d -= 1
        tn = d * 128
    else:
        tn = N_pad
        bt = int(max(1, min(B, blk_budget // inst_bytes)))
        # Prefer >= 4 blocks on the "parallel" batch axis (balances the two
        # v7x TensorCores) as long as blocks keep >= ~2 MiB of A.
        min_bt = max(1, (2 << 20) // inst_bytes)
        if B >= 4 * min_bt:
            bt = max(min(bt, _cdiv(B, 4)), min_bt)

    nblk = _cdiv(B, bt)
    n_nt = N_pad // tn
    B_pad = nblk * bt

    # ---- pack the small per-instance vectors (3 lane-dense DMA streams) -----
    b_mask = (jnp.arange(M)[None, :] < m_sizes[:, None]).astype(f32)
    c_mask = (jnp.arange(N)[None, :] < n_sizes[:, None]).astype(f32)
    lam_v = lam_pad.astype(f32) * b_mask
    b_v = b_pad.astype(f32) * b_mask
    x_v = x_pad.astype(f32) * c_mask
    c_v = c_pad.astype(f32) * c_mask

    m_f = m_sizes.astype(f32)
    n_f = n_sizes.astype(f32)
    inv_m = jnp.where(m_f > 0, 1.0 / jnp.maximum(m_f, 1.0), 0.0) / B
    inv_n = jnp.where(n_f > 0, 1.0 / jnp.maximum(n_f, 1.0), 0.0) / B

    def pack(v0, v1, inv, width_pad):
        pad_w = width_pad - v0.shape[1]
        rows = jnp.stack(
            [jnp.pad(v0, ((0, 0), (0, pad_w))),
             jnp.pad(v1, ((0, 0), (0, pad_w))),
             jnp.broadcast_to(inv[:, None], (B, width_pad))],
            axis=1)                                         # (B, 3, width_pad)
        return jnp.pad(rows, ((0, B_pad - B), (0, 8 - 3), (0, 0)))

    vec_m = pack(lam_v, b_v, inv_m, M_pad)
    vec_n = pack(x_v, c_v, inv_n, N_pad)

    # ---- A: used as-is when already padded bf16 (no HBM re-materialization) -
    a_in = a_pad if a_pad.dtype == jnp.bfloat16 else a_pad.astype(jnp.bfloat16)
    if (B_pad, M_pad, N_pad) != (B, M, N):
        a_in = jnp.pad(a_in, ((0, B_pad - B), (0, M_pad - M), (0, N_pad - N)))

    kernel = _make_kkt_kernel(float(w_primal), float(w_dual),
                              float(w_station), float(w_comp))

    # VMEM: double-buffered bf16 A + packed-vector blocks + scratch (the f32
    # copy of A is gone).
    a_blk = bt * M_pad * tn * 2
    vec_blk = bt * 8 * (M_pad + tn) * 4
    scratch = bt * (M_pad + 128) * 4
    est = 2 * a_blk + 2 * vec_blk + scratch + (4 << 20)
    vmem_limit = int(min(max(est, 16 << 20), vmem_ceiling))

    partials = pl.pallas_call(
        kernel,
        out_shape=jax.ShapeDtypeStruct((nblk, 8, 128), jnp.float32),
        grid_spec=pltpu.PrefetchScalarGridSpec(
            num_scalar_prefetch=0,
            grid=(nblk, n_nt),
            in_specs=[
                pl.BlockSpec((bt, M_pad, tn), lambda i, k: (i, 0, k)),   # A
                pl.BlockSpec((bt, 8, M_pad), lambda i, k: (i, 0, 0)),    # lam/b/1m
                pl.BlockSpec((bt, 8, tn), lambda i, k: (i, 0, k)),       # x/c/1n
            ],
            out_specs=pl.BlockSpec((1, 8, 128), lambda i, k: (i, 0, 0)),
            scratch_shapes=[pltpu.VMEM((bt, M_pad), jnp.float32),
                            pltpu.VMEM((bt, 1), jnp.float32)],
        ),
        compiler_params=pltpu.CompilerParams(
            dimension_semantics=("parallel", "arbitrary"),
            vmem_limit_bytes=vmem_limit),
    )(a_in, vec_m, vec_n)

    return jnp.sum(partials[:, 0, 0])


def kkt_loss_ref(a_pad, x_pad, lam_pad, b_pad, c_pad, m_sizes, n_sizes,
                 w_primal=0.1, w_dual=0.1, w_station=0.6, w_comp=0.2):
    """Pure-JAX mirror of the PyTorch per-instance loop, using the same
    bf16-rounded A / x / lambda the kernel feeds to the MXU (all elementwise
    math in f32)."""
    a_q = a_pad.astype(jnp.bfloat16).astype(jnp.float32)
    x_q = x_pad.astype(jnp.bfloat16).astype(jnp.float32)
    lam_q = lam_pad.astype(jnp.bfloat16).astype(jnp.float32)
    B = a_pad.shape[0]
    lp = ld = ls = lc = 0.0
    for i in range(B):
        m, n = int(m_sizes[i]), int(n_sizes[i])
        A = a_q[i, :m, :n]
        ax_minus_b = A @ x_q[i, :n] - b_pad[i, :m]
        lam = lam_pad[i, :m]
        lp += jnp.mean(jnp.maximum(ax_minus_b, 0.0) ** 2)
        ld += jnp.mean(jnp.maximum(-lam, 0.0) ** 2)
        ls += jnp.mean((c_pad[i, :n] + A.T @ lam_q[i, :m]) ** 2)
        lc += jnp.mean((lam * ax_minus_b) ** 2)
    lp, ld, ls, lc = lp / B, ld / B, ls / B, lc / B
    # NOTE: the PyTorch forward references `self.w_stat`; we read it as the
    # initialized `self.w_station`.  `reduction` is unused by that forward.
    return w_primal * lp + w_dual * ld + w_station * ls + w_comp * lc


if __name__ == "__main__":
    # Small batch: B=2 LPs, M_max=16 constraints, N_max=128 variables.
    B, M_MAX, N_MAX = 2, 16, 128
    m_sizes = jnp.array([12, 16], dtype=jnp.int32)
    n_sizes = jnp.array([128, 90], dtype=jnp.int32)

    key = jax.random.PRNGKey(0)
    k_a, k_x, k_l, k_b, k_c = jax.random.split(key, 5)

    # Dense padded A with invalid rows / cols zeroed out (layout contract).
    row_ids = jnp.arange(M_MAX)[None, :, None]
    col_ids = jnp.arange(N_MAX)[None, None, :]
    a_valid = ((row_ids < m_sizes[:, None, None])
               & (col_ids < n_sizes[:, None, None])).astype(jnp.float32)
    a_f32 = jax.random.normal(k_a, (B, M_MAX, N_MAX), jnp.float32) * a_valid
    # "Upstream" storage: padded + bf16, so the kernel wrapper never
    # re-materializes A in HBM (perf-review item 7).
    a_bf16 = a_f32.astype(jnp.bfloat16)

    b_mask = (jnp.arange(M_MAX)[None, :] < m_sizes[:, None]).astype(jnp.float32)
    c_mask = (jnp.arange(N_MAX)[None, :] < n_sizes[:, None]).astype(jnp.float32)

    b_pad = jax.random.normal(k_b, (B, M_MAX), jnp.float32)
    c_pad = jax.random.normal(k_c, (B, N_MAX), jnp.float32)

    # x_hat / lam_hat (flat concatenations in the PyTorch API) pre-split into
    # the padded per-instance layout; padded entries are zero.
    x_pad = jax.random.normal(k_x, (B, N_MAX), jnp.float32) * c_mask
    lam_pad = jax.random.normal(k_l, (B, M_MAX), jnp.float32) * b_mask

    loss = kkt_loss_pallas(a_bf16, x_pad, lam_pad, b_pad, c_pad,
                           m_sizes, n_sizes)
    loss = jax.block_until_ready(loss)

    loss_ref = kkt_loss_ref(a_bf16, x_pad, lam_pad, b_pad, c_pad,
                            np.asarray(m_sizes), np.asarray(n_sizes))
    np.testing.assert_allclose(np.asarray(loss), np.asarray(loss_ref),
                               rtol=1e-4, atol=1e-6)
    print("KERNEL_OK")
</pallas_src>

<mosaic_0001>
module attributes {stable_mosaic.version = 11 : i64} {
  func.func @kernel(%arg0: i32, %arg1: i32, %arg2: memref<2x16x128xbf16, #tpu.memory_space<vmem>>, %arg3: memref<2x8x16xf32, #tpu.memory_space<vmem>>, %arg4: memref<2x8x128xf32, #tpu.memory_space<vmem>>, %arg5: memref<1x8x128xf32, #tpu.memory_space<vmem>>, %arg6: memref<2x16xf32, #tpu.memory_space<vmem>>, %arg7: memref<2x1xf32, #tpu.memory_space<vmem>>) attributes {dimension_semantics = [#tpu.dimension_semantics<parallel>, #tpu.dimension_semantics<arbitrary>], iteration_bounds = array<i64: 1, 1>, scalar_prefetch = 0 : i64, scratch_operands = 2 : i64, tpu.core_type = #tpu.core_type<tc>, window_params = [{transform_indices = @transform_0, window_bounds = array<i64: 2, 16, 128>}, {transform_indices = @transform_1, window_bounds = array<i64: 2, 8, 16>}, {transform_indices = @transform_2, window_bounds = array<i64: 2, 8, 128>}, {transform_indices = @transform_3, window_bounds = array<i64: 1, 8, 128>}]} {
    %c0_i32 = arith.constant 0 : i32
    %0 = arith.cmpi eq, %arg1, %c0_i32 : i32
    %1 = arith.extui %0 : i1 to i32
    %c0_i32_0 = arith.constant 0 : i32
    %2 = arith.cmpi ne, %1, %c0_i32_0 : i32
    scf.if %2 {
      %cst_24 = arith.constant 0.000000e+00 : f32
      %27 = vector.broadcast %cst_24 : f32 to vector<2x16xf32>
      %c0_25 = arith.constant 0 : index
      %c0_26 = arith.constant 0 : index
      %28 = vector.load %arg6[%c0_25, %c0_26] : memref<2x16xf32, #tpu.memory_space<vmem>>, vector<2x16xf32>
      tpu.vector_store %arg6[%c0_25, %c0_26], %27 {strides = array<i32>} : memref<2x16xf32, #tpu.memory_space<vmem>>, vector<2x16xf32>,
      %cst_27 = arith.constant 0.000000e+00 : f32
      %29 = vector.broadcast %cst_27 : f32 to vector<2x1xf32>
      %c0_28 = arith.constant 0 : index
      %c0_29 = arith.constant 0 : index
      %30 = vector.load %arg7[%c0_28, %c0_29] : memref<2x1xf32, #tpu.memory_space<vmem>>, vector<2x1xf32>
      tpu.vector_store %arg7[%c0_28, %c0_29], %29 {strides = array<i32>} : memref<2x1xf32, #tpu.memory_space<vmem>>, vector<2x1xf32>,
    } else {
    }
    %c0 = arith.constant 0 : index
    %c0_1 = arith.constant 0 : index
    %c0_2 = arith.constant 0 : index
    %3 = vector.load %arg2[%c0, %c0_1, %c0_2] : memref<2x16x128xbf16, #tpu.memory_space<vmem>>, vector<2x16x128xbf16>
    %c0_3 = arith.constant 0 : index
    %c0_4 = arith.constant 0 : index
    %c0_5 = arith.constant 0 : index
    %4 = vector.load %arg4[%c0_3, %c0_4, %c0_5] : memref<2x8x128xf32, #tpu.memory_space<vmem>>, vector<2x1x128xf32>
    %5 = arith.truncf %4 : vector<2x1x128xf32> to vector<2x1x128xbf16>
    %c0_6 = arith.constant 0 : index
    %c0_7 = arith.constant 0 : index
    %c0_8 = arith.constant 0 : index
    %6 = vector.load %arg3[%c0_6, %c0_7, %c0_8] : memref<2x8x16xf32, #tpu.memory_space<vmem>>, vector<2x1x16xf32>
    %7 = arith.truncf %6 : vector<2x1x16xf32> to vector<2x1x16xbf16>
    "tpu.trace_start"() <{level = 10 : i32, message = "bmn,bkn->bmk"}> : () -> ()
    %cst = arith.constant dense<0.000000e+00> : vector<2x16x1xf32>
    %8 = tpu.matmul %3, %5, %cst {dimension_numbers = #tpu.dot_dimension_numbers<[2], [2], [1], [1], [0, 0, 0, 1, 1, 1], [0], [0]>} : vector<2x16x128xbf16>, vector<2x1x128xbf16>, vector<2x16x1xf32> -> vector<2x16x1xf32>
    "tpu.trace_stop"() : () -> ()
    %c0_9 = arith.constant 0 : index
    %c0_10 = arith.constant 0 : index
    %9 = vector.load %arg6[%c0_9, %c0_10] : memref<2x16xf32, #tpu.memory_space<vmem>>, vector<2x16xf32>
    %cst_11 = arith.constant dense<0.000000e+00> : vector<2x16xf32>
    %10 = vector.multi_reduction <add>, %8, %cst_11 [2] : vector<2x16x1xf32> to vector<2x16xf32>
    %11 = arith.addf %9, %10 : vector<2x16xf32>
    %c0_12 = arith.constant 0 : index
    %c0_13 = arith.constant 0 : index
    %12 = vector.load %arg6[%c0_12, %c0_13] : memref<2x16xf32, #tpu.memory_space<vmem>>, vector<2x16xf32>
    tpu.vector_store %arg6[%c0_12, %c0_13], %11 {strides = array<i32>} : memref<2x16xf32, #tpu.memory_space<vmem>>, vector<2x16xf32>,
    "tpu.trace_start"() <{level = 10 : i32, message = "bkm,bmn->bkn"}> : () -> ()
    %cst_14 = arith.constant dense<0.000000e+00> : vector<2x1x128xf32>
    %13 = tpu.matmul %7, %3, %cst_14 {dimension_numbers = #tpu.dot_dimension_numbers<[2], [1], [1], [2], [0, 0, 0, 1, 1, 2], [0], [0]>} : vector<2x1x16xbf16>, vector<2x16x128xbf16>, vector<2x1x128xf32> -> vector<2x1x128xf32>
    "tpu.trace_stop"() : () -> ()
    %c0_15 = arith.constant 0 : index
    %c1 = arith.constant 1 : index
    %c0_16 = arith.constant 0 : index
    %14 = vector.load %arg4[%c0_15, %c1, %c0_16] : memref<2x8x128xf32, #tpu.memory_space<vmem>>, vector<2x1x128xf32>
    %15 = vector.shape_cast %14 : vector<2x1x128xf32> to vector<2x128xf32>
    %16 = vector.shape_cast %13 : vector<2x1x128xf32> to vector<2x128xf32>
    %17 = arith.addf %15, %16 : vector<2x128xf32>
    %c0_17 = arith.constant 0 : index
    %c0_18 = arith.constant 0 : index
    %18 = vector.load %arg7[%c0_17, %c0_18] : memref<2x1xf32, #tpu.memory_space<vmem>>, vector<2x1xf32>
    %19 = arith.mulf %17, %17 : vector<2x128xf32>
    %cst_19 = arith.constant dense<0.000000e+00> : vector<2xf32>
    %20 = vector.multi_reduction <add>, %19, %cst_19 [1] : vector<2x128xf32> to vector<2xf32>
    %21 = vector.shape_cast %20 : vector<2xf32> to vector<2x1xf32>
    %22 = arith.addf %18, %21 : vector<2x1xf32>
    %c0_20 = arith.constant 0 : index
    %c0_21 = arith.constant 0 : index
    %23 = vector.load %arg7[%c0_20, %c0_21] : memref<2x1xf32, #tpu.memory_space<vmem>>, vector<2x1xf32>
    tpu.vector_store %arg7[%c0_20, %c0_21], %22 {strides = array<i32>} : memref<2x1xf32, #tpu.memory_space<vmem>>, vector<2x1xf32>,
    %c0_i32_22 = arith.constant 0 : i32
    %24 = arith.cmpi eq, %arg1, %c0_i32_22 : i32
    %25 = arith.extui %24 : i1 to i32
    %c0_i32_23 = arith.constant 0 : i32
    %26 = arith.cmpi ne, %25, %c0_i32_23 : i32
    scf.if %26 {
      %c0_24 = arith.constant 0 : index
      %c0_25 = arith.constant 0 : index
      %c0_26 = arith.constant 0 : index
      %27 = vector.load %arg3[%c0_24, %c0_25, %c0_26] : memref<2x8x16xf32, #tpu.memory_space<vmem>>, vector<2x1x16xf32>
      %28 = vector.shape_cast %27 : vector<2x1x16xf32> to vector<2x16xf32>
      %c0_27 = arith.constant 0 : index
      %c1_28 = arith.constant 1 : index
      %c0_29 = arith.constant 0 : index
      %29 = vector.load %arg3[%c0_27, %c1_28, %c0_29] : memref<2x8x16xf32, #tpu.memory_space<vmem>>, vector<2x1x16xf32>
      %30 = vector.shape_cast %29 : vector<2x1x16xf32> to vector<2x16xf32>
      %c0_30 = arith.constant 0 : index
      %c2 = arith.constant 2 : index
      %c0_31 = arith.constant 0 : index
      %31 = vector.load %arg3[%c0_30, %c2, %c0_31] : memref<2x8x16xf32, #tpu.memory_space<vmem>>, vector<2x1x16xf32>
      %32 = vector.shape_cast %31 : vector<2x1x16xf32> to vector<2x16xf32>
      %33 = vector.extract_strided_slice %32 {offsets = [0, 0], sizes = [2, 1], strides = [1, 1]} : vector<2x16xf32> to vector<2x1xf32>
      %c0_32 = arith.constant 0 : index
      %c2_33 = arith.constant 2 : index
      %c0_34 = arith.constant 0 : index
      %34 = vector.load %arg4[%c0_32, %c2_33, %c0_34] : memref<2x8x128xf32, #tpu.memory_space<vmem>>, vector<2x1x128xf32>
      %35 = vector.shape_cast %34 : vector<2x1x128xf32> to vector<2x128xf32>
      %36 = vector.extract_strided_slice %35 {offsets = [0, 0], sizes = [2, 1], strides = [1, 1]} : vector<2x128xf32> to vector<2x1xf32>
      %c0_35 = arith.constant 0 : index
      %c0_36 = arith.constant 0 : index
      %37 = vector.load %arg6[%c0_35, %c0_36] : memref<2x16xf32, #tpu.memory_space<vmem>>, vector<2x16xf32>
      %38 = arith.subf %37, %30 : vector<2x16xf32>
      %cst_37 = arith.constant 0.000000e+00 : f32
      %39 = vector.broadcast %cst_37 : f32 to vector<2x16xf32>
      %40 = arith.maximumf %38, %39 : vector<2x16xf32>
      %41 = arith.mulf %40, %40 : vector<2x16xf32>
      %cst_38 = arith.constant 1.000000e-01 : f32
      %42 = vector.broadcast %cst_38 : f32 to vector<2x16xf32>
      %43 = arith.mulf %42, %41 : vector<2x16xf32>
      %cst_39 = arith.constant 0.000000e+00 : f32
      %44 = vector.broadcast %cst_39 : f32 to vector<2x16xf32>
      %45 = arith.subf %44, %28 : vector<2x16xf32>
      %cst_40 = arith.constant 0.000000e+00 : f32
      %46 = vector.broadcast %cst_40 : f32 to vector<2x16xf32>
      %47 = arith.maximumf %45, %46 : vector<2x16xf32>
      %48 = arith.mulf %47, %47 : vector<2x16xf32>
      %cst_41 = arith.constant 1.000000e-01 : f32
      %49 = vector.broadcast %cst_41 : f32 to vector<2x16xf32>
      %50 = arith.mulf %49, %48 : vector<2x16xf32>
      %51 = arith.addf %43, %50 : vector<2x16xf32>
      %52 = arith.mulf %28, %38 : vector<2x16xf32>
      %53 = arith.mulf %52, %52 : vector<2x16xf32>
      %cst_42 = arith.constant 2.000000e-01 : f32
      %54 = vector.broadcast %cst_42 : f32 to vector<2x16xf32>
      %55 = arith.mulf %54, %53 : vector<2x16xf32>
      %56 = arith.addf %51, %55 : vector<2x16xf32>
      %cst_43 = arith.constant dense<0.000000e+00> : vector<2xf32>
      %57 = vector.multi_reduction <add>, %56, %cst_43 [1] : vector<2x16xf32> to vector<2xf32>
      %58 = vector.shape_cast %57 : vector<2xf32> to vector<2x1xf32>
      %59 = arith.mulf %58, %33 : vector<2x1xf32>
      %c0_44 = arith.constant 0 : index
      %c0_45 = arith.constant 0 : index
      %60 = vector.load %arg7[%c0_44, %c0_45] : memref<2x1xf32, #tpu.memory_space<vmem>>, vector<2x1xf32>
      %cst_46 = arith.constant 6.000000e-01 : f32
      %61 = vector.broadcast %cst_46 : f32 to vector<2x1xf32>
      %62 = arith.mulf %61, %60 : vector<2x1xf32>
      %63 = arith.mulf %62, %36 : vector<2x1xf32>
      %64 = arith.addf %59, %63 : vector<2x1xf32>
      %65 = vector.shape_cast %64 : vector<2x1xf32> to vector<1x2x1xf32>
      %cst_47 = arith.constant dense<0.000000e+00> : vector<1xf32>
      %66 = vector.multi_reduction <add>, %65, %cst_47 [1, 2] : vector<1x2x1xf32> to vector<1xf32>
      %67 = vector.shape_cast %66 : vector<1xf32> to vector<1x1x1xf32>
      %68 = vector.extract %67[0, 0, 0] : f32 from vector<1x1x1xf32>
      %69 = vector.broadcast %68 : f32 to vector<1x8x128xf32>
      %c0_48 = arith.constant 0 : index
      %c0_49 = arith.constant 0 : index
      %c0_50 = arith.constant 0 : index
      %70 = vector.load %arg5[%c0_48, %c0_49, %c0_50] : memref<1x8x128xf32, #tpu.memory_space<vmem>>, vector<1x8x128xf32>
      tpu.vector_store %arg5[%c0_48, %c0_49, %c0_50], %69 {strides = array<i32>} : memref<1x8x128xf32, #tpu.memory_space<vmem>>, vector<1x8x128xf32>,
    } else {
    }
    return
  }
  func.func @transform_0(%arg0: i32, %arg1: i32) -> (i32, i32, i32) {
    %c0_i32 = arith.constant 0 : i32
    %c0_i32_0 = arith.constant 0 : i32
    return %arg0, %c0_i32, %arg1 : i32, i32, i32
  }
  func.func @transform_1(%arg0: i32, %arg1: i32) -> (i32, i32, i32) {
    %c0_i32 = arith.constant 0 : i32
    %c0_i32_0 = arith.constant 0 : i32
    %c0_i32_1 = arith.constant 0 : i32
    return %arg0, %c0_i32, %c0_i32_0 : i32, i32, i32
  }
  func.func @transform_2(%arg0: i32, %arg1: i32) -> (i32, i32, i32) {
    %c0_i32 = arith.constant 0 : i32
    %c0_i32_0 = arith.constant 0 : i32
    return %arg0, %c0_i32, %arg1 : i32, i32, i32
  }
  func.func @transform_3(%arg0: i32, %arg1: i32) -> (i32, i32, i32) {
    %c0_i32 = arith.constant 0 : i32
    %c0_i32_0 = arith.constant 0 : i32
    %c0_i32_1 = arith.constant 0 : i32
    return %arg0, %c0_i32, %c0_i32_0 : i32, i32, i32
  }
}

</mosaic_0001>

<bundles_post_ra>
// kernel: kkt_loss_pallas.1
= control target key start
LH: loop header
LB: loop body
LE: loop exit
PB: predicated region body
PF: predicated region fallthrough
CT: control target
= control target key end

     0   :  { %v267_v3 = vmov 0   ;;  %vm112_vm0 = vcmask 130048   ;;  %vm19_vm1 = vcmask 123904   ;;  %v268_v15 = vmov 0.0   ;;  %s353_s2 = inlined_call_operand.vmem [shape: f32[2,8,128], index: 2, kind: input, shape index: {}]   ;;  %s354_s0 = inlined_call_operand.vmem [shape: bf16[2,16,128], index: 0, kind: input, shape index: {}]   ;;  %s355_s1 = inlined_call_operand.vmem [shape: f32[2,8,16], index: 1, kind: input, shape index: {}]   ;;  %s356_s3 = inlined_call_operand.vmem [shape: f32[1,8,128], index: 3, kind: output, shape index: {}]  }
   0x1   :  { %v27_v0 = vld [vmem:[%s353_s2] sm:$0x1]  ;;  %v28_v1 = vld [vmem:[%s353_s2 + $0x8] sm:$0x1]  ;;  %266 = vset.pattern.permute.xlu1 %v267_v3  ;;  %265 = vset.pattern.permute.xlu0 %v267_v3  ;;  %20 = vst.msk [vmem:[#allocation2] sm:$0x3] %vm19_vm1, %v268_v15  ;;  %v96_v29 = vlaneseq }
   0x2   :  { %v259_v2 = vld [vmem:[%s354_s0] sm:$0xff]  ;;  %v29_v4 = vpack.c.bf16 %v27_v0, %v27_v0  ;;  %v30_v5 = vpack.c.bf16 %v28_v1, %v28_v1  ;;  %v32_v6 = vld [vmem:[%s355_s1 + $0x8] sm:$0x1]  ;;  %v146_v17 = vld [vmem:[%s353_s2 + $0x9] sm:$0x1]  ;;  %vm157_vm2 = vcmask 1041408  }
   0x3   :  { %v31_v7 = vld [vmem:[%s355_s1] sm:$0x1]  ;;  %v260_v8 = vld [vmem:[%s354_s0 + $0x8] sm:$0xff]  ;;  %123 = vmatpush.bf16.msra.mxu2 %v259_v2  ;;  %v34_v10 = vpack.c.bf16 %v32_v6, %v32_v6  ;;  %v145_v19 = vld [vmem:[%s353_s2 + $0x1] sm:$0x1]  ;;  %vm106_vm3 = vcmask 1041409  }
   0x4   :  { %v33_v9 = vpack.c.bf16 %v31_v7, %v31_v7  ;;  %48 = vmatpush.bf16.xpose.msra.mxu0 %v29_v4  ;;  %68 = vmatpush.bf16.xpose.msra.mxu1 %v30_v5  ;;  %v97_v32 = vand.u32 127, %v96_v29  ;;  %vm21_vm4 = vcmask 1024   ;;  %vm101_vm5 = vcmask 130112   ;;  %v168_v36 = vld [vmem:[%s355_s1 + $0x8] sm:$0x1] }
   0x5   :  { %139 = vmatpush.bf16.msra.mxu3 %v260_v8  ;;  %22 = vst.msk [vmem:[#allocation3] sm:$0x3] %vm21_vm4, %v268_v15  ;;  %v186_v44 = vsub.f32 0.0, %v168_v36  ;;  %v167_v46 = vld [vmem:[%s355_s1] sm:$0x1] }
   0x6   :  { %257 = vmatmul.msk.bf16.vlgmr.msra.gmra.mxu2 %vm112_vm0, %v33_v9  ;;  %v99_v33 = vadd.s32 4294967288, %v97_v32  ;;  %v170_v48 = vld [vmem:[%s355_s1 + $0x9] sm:$0x1]  ;;  %v185_v49 = vsub.f32 0.0, %v167_v46  ;;  %v169_v52 = vld [vmem:[%s355_s1 + $0x1] sm:$0x1] }
   0x7   :  { %v188_v50 = vmax.f32 %v186_v44, 0.0  ;;  %v178_v51 = vrot.slane %v170_v48, 7 }
   0x8   :  { %258 = vmatmul.msk.bf16.vlgmr.msra.gmra.mxu3 %vm112_vm0, %v34_v10  ;;  %v75_v41 = vld [vmem:[#allocation2] sm:$0x3]  ;;  %v187_v53 = vmax.f32 %v185_v49, 0.0 }
   0x9   :  { %v190_v54 = vmul.f32 %v188_v50, %v188_v50  ;;  %v179_v55 = vsel %vm106_vm3, %v178_v51, %v169_v52 }
   0xa   :  { %v189_v58 = vmul.f32 %v187_v53, %v187_v53 }
   0xb   :  { %49 = vmatmul.bf16.vlgmr.msra.gmra.mxu0 %v259_v2  ;;  %69 = vmatmul.bf16.vlgmr.msra.gmra.mxu1 %v260_v8  ;;  %v192_v59 = vmul.f32 0.1, %v190_v54 }
   0xc   :  { %v191_v0 = vmul.f32 0.1, %v189_v58 }
   0xd   :  { %v195_v1 = vrot.slane %v192_v59, 7 }
   0xf   :  { %v196_v6 = vsel %vm106_vm3, %v195_v1, %v191_v0 }
  0x88   :  { %v50_v11 = vpop.f32.mrf.mxu0  ;;  %v70_v12 = vpop.f32.mrf.mxu1 }
  0x89   :  { %91 = vperm.xlu1 %266, %v70_v12   ;;  %85 = vperm.xlu0 %265, %v50_v11   ;;  %v125_v18 = vpop.f32.mrf.mxu2 }
  0x8a   :  { %v147_v21 = vadd.f32 %v145_v19, %v125_v18  ;;  %v172_v18 = vld [vmem:[%s355_s1 + $0xa] sm:$0x1] }
  0x8b   :  { %v141_v16 = vpop.f32.mrf.mxu3 }
  0x8c   :  { %v148_v20 = vadd.f32 %v146_v17, %v141_v16  ;;  %v150_v23 = vmul.f32 %v147_v21, %v147_v21  ;;  %v174_v17 = vld [vmem:[%s353_s2 + $0xa] sm:$0x1]  ;;  %v173_v21 = vld [vmem:[%s353_s2 + $0x2] sm:$0x1] }
  0x8e   :  { %v151_v22 = vmul.f32 %v148_v20, %v148_v20  ;;  %v228_v20 = vrot.slane %v174_v17, 7 }
  0x90   :  { %v52_v13 = vpop.f32.mrf.mxu0  ;;  %v72_v14 = vpop.f32.mrf.mxu1  ;;  %v154_v24 = vrot.slane %v151_v22, 7  ;;  %v220_v22 = vrot.slane %v172_v18, 7 }
  0x91   :  { %94 = vperm.xlu1 %266, %v72_v14   ;;  %88 = vperm.xlu0 %265, %v52_v13   ;;  %v127_v27 = vpop.f32.mrf.mxu2  ;;  %v149_v14 = vld [vmem:[#allocation3] sm:$0x3] }
  0x92   :  { %v155_v26 = vsel %vm106_vm3, %v154_v24, %v150_v23  ;;  %v171_v23 = vld [vmem:[%s355_s1 + $0x2] sm:$0x1] }
  0x93   :  { %v143_v25 = vpop.f32.mrf.mxu3  ;;  %v158_v28 = vsel %vm157_vm2, %v155_v26, 0.0  ;;  %v221_v26 = vsel %vm106_vm3, %v220_v22, %v171_v23 }
  0x94   :  { %159 = vadd.xlane.f32.xlu2 %v158_v28  ;;  %v229_v25 = vsel %vm106_vm3, %v228_v20, %v173_v21 }
  0xfb   :  { %v92_v30 = vpop.permute.xlu1 %91  ;;  %v86_v31 = vpop.permute.xlu0 %85 }
  0xfc   :  { %v103_v37 = vperm.slane %v92_v30, %v97_v32  ;;  %v98_v38 = vperm.slane %v86_v31, %v97_v32 }
 0x103   :  { %v95_v34 = vpop.permute.xlu1 %94  ;;  %v89_v35 = vpop.permute.xlu0 %88 }
 0x104   :  { %v104_v39 = vperm.slane %v95_v34, %v99_v33  ;;  %v100_v40 = vperm.slane %v89_v35, %v99_v33 }
 0x106   :  { %v105_v42 = vsel %vm101_vm5, %v104_v39, %v103_v37  ;;  %v102_v43 = vsel %vm101_vm5, %v100_v40, %v98_v38 }
 0x107   :  { %v107_v45 = vsel %vm106_vm3, %v105_v42, %v102_v43  ;;  %v160_v15 = vpop.xlane.xlu2 %159 }
 0x108   :  { %v109_v47 = vadd.f32 %v107_v45, %v75_v41  ;;  %v161_v16 = vadd.f32 %v160_v15, %v149_v14 }
 0x10a   :  { %111 = vst.msk [vmem:[#allocation2] sm:$0x3] %vm19_vm1, %v109_v47 }
 0x10b   :  { %163 = vst.msk [vmem:[#allocation3] sm:$0x3] %vm21_vm4, %v161_v16 }
 0x111   :  { %v175_v56 = vld [vmem:[#allocation2] sm:$0x3] }
 0x112   :  { %v181_v57 = vsub.f32 %v175_v56, %v179_v55  ;;  %v224_v19 = vld [vmem:[#allocation3] sm:$0x3] }
 0x113   :  { %v225_v24 = vmul.f32 0.6, %v224_v19 }
 0x114   :  { %v182_v60 = vmax.f32 %v181_v57, 0.0  ;;  %v200_v61 = vrot.slane %v181_v57, 1  ;;  %v203_v62 = vmul.f32 %v181_v57, %v167_v46 }
 0x115   :  { %v231_v27 = vmul.f32 %v229_v25, %v225_v24 }
 0x116   :  { %v183_v63 = vmul.f32 %v182_v60, %v182_v60  ;;  %v204_v2 = vmul.f32 %v200_v61, %v168_v36  ;;  %v205_v3 = vmul.f32 %v203_v62, %v203_v62 }
 0x118   :  { %v206_v4 = vmul.f32 %v204_v2, %v204_v2  ;;  %v184_v5 = vmul.f32 0.1, %v183_v63  ;;  %v207_v8 = vmul.f32 0.2, %v205_v3 }
 0x11a   :  { %v208_v7 = vmul.f32 0.2, %v206_v4  ;;  %v198_v10 = vadd.f32 %v196_v6, %v184_v5 }
 0x11c   :  { %v211_v9 = vrot.slane %v208_v7, 7 }
 0x11e   :  { %v212_v11 = vsel %vm106_vm3, %v211_v9, %v207_v8 }
 0x11f   :  { %v214_v12 = vadd.f32 %v212_v11, %v198_v10 }
 0x121   :  { %v215_v13 = vsel %vm19_vm1, %v214_v12, 0.0 }
 0x122   :  { %216 = vadd.xlane.f32.xlu2 %v215_v13 }
 0x195   :  { %v217_v28 = vpop.xlane.xlu2 %216 }
 0x196   :  { %v223_v29 = vmul.f32 %v221_v26, %v217_v28 }
 0x198   :  { %v232_v30 = vadd.f32 %v231_v27, %v223_v29 }
 0x19a   :  { %v233_v31 = vsel %vm21_vm4, %v232_v30, 0.0 }
 0x19b   :  { %234 = vadd.xlane.f32.xlu0 %v233_v31 }
 0x20e   :  { %v235_v32 = vpop.xlane.xlu0 %234 }
 0x20f   :  { %v236_v33 = vrot.slane %v235_v32, 4 }
 0x211   :  { %v237_v34 = vadd.f32 %v236_v33, %v235_v32 }
 0x213   :  { %v238_v35 = vrot.slane %v237_v34, 2 }
 0x215   :  { %v239_v36 = vadd.f32 %v238_v35, %v237_v34 }
 0x217   :  { %v240_v37 = vrot.slane %v239_v36, 1 }
 0x219   :  { %v241_v38 = vadd.f32 %v240_v37, %v239_v36 }
 0x21b   :  { %261 = vpush %v241_v38 }
 0x24c   :  { %s262_s1 = spop %261 }
 0x24d   :  { %v243_v39 = vstv %s262_s1 }
 0x24e   :  { %244 = vst [vmem:[%s356_s3] sm:$0xff] %v243_v39 }

</bundles_post_ra>
